<compile_context>
chip_gen: v5e
topology: v5e:2x2
jax: 0.10.0
libtpu: 0.0.40
codegen_flags: <defaults>
</compile_context>

<pallas_src>
import math
from functools import partial

import jax
import jax.numpy as jnp
from jax.experimental import pallas as pl
from jax.experimental.pallas import tpu as pltpu


def _mlp_kernel(x_ref, w1_ref, b1_ref, w2_ref, b2_ref, o_ref):
    # x_ref:  (TB, D) f32  -- pipelined batch tile, native dtype (no HBM copy)
    # w1_ref: (D, H)  bf16 -- VMEM-resident across the whole grid
    # b1_ref: (1, H)  f32
    # w2_ref: (H, C)  bf16 -- VMEM-resident
    # b2_ref: (1, C)  f32
    # o_ref:  (TB, C) f32  -- narrow logits block, written directly
    x = x_ref[...].astype(jnp.bfloat16)          # cast in-kernel (review #1)
    h = jnp.dot(x, w1_ref[...], preferred_element_type=jnp.float32)
    h = jnp.maximum(h + b1_ref[...], 0.0)        # bias + ReLU in f32
    out = jnp.dot(h.astype(jnp.bfloat16), w2_ref[...],
                  preferred_element_type=jnp.float32)
    o_ref[...] = (out + b2_ref[...]).astype(o_ref.dtype)


def _round_up(a, m):
    return (a + m - 1) // m * m


def _choose_tb(n_rows, d, block_batch, vmem_budget_bytes=6 << 20):
    """Batch-tile size.

    Per-step VMEM is dominated by the double-buffered f32 x tile
    (2 * TB * D * 4 bytes) plus a small lane-padded output tile; keep the
    x tiles under a conservative budget so the kernel fits every
    generation's scoped-VMEM default (v5e 16 MiB, v7x 32/64 MiB).
    """
    tb = max(8, (vmem_budget_bytes // (8 * max(d, 1))) // 8 * 8)
    tb = min(tb, block_batch)
    if n_rows >= 256:
        # >=2 grid steps so dimension_semantics=("parallel",) can shard the
        # batch axis across v7x's two TensorCores.
        tb = min(tb, _round_up(pl.cdiv(n_rows, 2), 8))
    if n_rows <= tb:
        # Single block equal to the full batch (block dims equal to the full
        # array dims are exempt from the (8,128) divisibility rule).
        tb = n_rows
    return tb


def prepare_params(w1, b1, w2, b2):
    """One-time weight prep (hoisted out of the per-call hot path).

    w1: (D, 64), b1: (64,), w2: (64, 2), b2: (2,)  -- (in, out) layout.
    """
    h = w1.shape[1]
    c = w2.shape[1]
    return (jnp.asarray(w1, jnp.bfloat16),
            jnp.asarray(b1, jnp.float32).reshape(1, h),
            jnp.asarray(w2, jnp.bfloat16),
            jnp.asarray(b2, jnp.float32).reshape(1, c))


@partial(jax.jit, static_argnames=("block_batch",))
def object_type_classifier(x, params, *, block_batch=512):
    """Fused Linear(D,64) -> ReLU -> Linear(64,2). x: (..., D) f32."""
    w1, b1, w2, b2 = params
    d = x.shape[-1]
    h = w1.shape[1]
    c = w2.shape[1]

    x2 = x.reshape(-1, d)                 # collapse leading dims (free)
    n = x2.shape[0]
    tb = _choose_tb(n, d, block_batch)
    grid = (pl.cdiv(n, tb),)

    flops = 2 * n * (d * h + h * c)
    bytes_accessed = (n * d * 4                      # x read (f32, once)
                      + d * h * 2 + h * c * 2        # bf16 weights
                      + (h + c) * 4                  # biases
                      + n * c * 4)                   # logits write

    out = pl.pallas_call(
        _mlp_kernel,
        out_shape=jax.ShapeDtypeStruct((n, c), jnp.float32),
        grid=grid,
        in_specs=[
            pl.BlockSpec((tb, d), lambda i: (i, 0)),   # x: pipelined tiles
            pl.BlockSpec((d, h), lambda i: (0, 0)),    # w1: resident
            pl.BlockSpec((1, h), lambda i: (0, 0)),    # b1: resident
            pl.BlockSpec((h, c), lambda i: (0, 0)),    # w2: resident
            pl.BlockSpec((1, c), lambda i: (0, 0)),    # b2: resident
        ],
        out_specs=pl.BlockSpec((tb, c), lambda i: (i, 0)),
        compiler_params=pltpu.CompilerParams(
            dimension_semantics=("parallel",),
            vmem_limit_bytes=32 * 1024 * 1024),
        cost_estimate=pl.CostEstimate(
            flops=flops, transcendentals=0, bytes_accessed=bytes_accessed),
    )(x2, w1, b1, w2, b2)

    return out.reshape(*x.shape[:-1], c)


def _reference(x, w1, b1, w2, b2):
    hh = jnp.maximum(x @ w1 + b1, 0.0)
    return hh @ w2 + b2


if __name__ == "__main__":
    key = jax.random.PRNGKey(0)
    k_x, k_w1, k_b1, k_w2, k_b2, k_x2 = jax.random.split(key, 6)

    input_dim, hidden, n_classes = 32, 64, 2

    w1 = jax.random.normal(k_w1, (input_dim, hidden), dtype=jnp.float32) * 0.1
    b1 = jax.random.normal(k_b1, (hidden,), dtype=jnp.float32) * 0.1
    w2 = jax.random.normal(k_w2, (hidden, n_classes), dtype=jnp.float32) * 0.1
    b2 = jax.random.normal(k_b2, (n_classes,), dtype=jnp.float32) * 0.1
    params = prepare_params(w1, b1, w2, b2)   # done once, off the hot path

    # Small 3-D "grounding token" input: (batch=2, n_objs=4, D) -> (2, 4, 2).
    x_small = jax.random.normal(k_x, (2, 4, input_dim), dtype=jnp.float32)
    out_small = jax.block_until_ready(object_type_classifier(x_small, params))
    ref_small = _reference(x_small, w1, b1, w2, b2)
    assert out_small.shape == (2, 4, n_classes)
    # bf16 matmul operands (f32 accumulation) -> loosened tolerance.
    assert jnp.allclose(out_small, ref_small, atol=5e-2, rtol=5e-2)

    # Larger flat batch: exercises the multi-step pipelined grid (grid=(2,)).
    x_big = jax.random.normal(k_x2, (256, input_dim), dtype=jnp.float32)
    out_big = jax.block_until_ready(object_type_classifier(x_big, params))
    ref_big = _reference(x_big, w1, b1, w2, b2)
    assert out_big.shape == (256, n_classes)
    assert jnp.allclose(out_big, ref_big, atol=5e-2, rtol=5e-2)

    print("KERNEL_OK")
</pallas_src>

<mosaic_0001>
module attributes {stable_mosaic.version = 11 : i64} {
  func.func @_mlp_kernel(%arg0: i32, %arg1: memref<8x32xf32, #tpu.memory_space<vmem>>, %arg2: memref<32x64xbf16, #tpu.memory_space<vmem>>, %arg3: memref<1x64xf32, #tpu.memory_space<vmem>>, %arg4: memref<64x2xbf16, #tpu.memory_space<vmem>>, %arg5: memref<1x2xf32, #tpu.memory_space<vmem>>, %arg6: memref<8x2xf32, #tpu.memory_space<vmem>>) attributes {dimension_semantics = [#tpu.dimension_semantics<parallel>], iteration_bounds = array<i64: 1>, scalar_prefetch = 0 : i64, scratch_operands = 0 : i64, tpu.core_type = #tpu.core_type<tc>, window_params = [{transform_indices = @transform_0, window_bounds = array<i64: 8, 32>}, {pipeline_mode = #tpu.pipeline_mode<synchronous>, transform_indices = @transform_1, window_bounds = array<i64: 32, 64>}, {pipeline_mode = #tpu.pipeline_mode<synchronous>, transform_indices = @transform_2, window_bounds = array<i64: 1, 64>}, {pipeline_mode = #tpu.pipeline_mode<synchronous>, transform_indices = @transform_3, window_bounds = array<i64: 64, 2>}, {pipeline_mode = #tpu.pipeline_mode<synchronous>, transform_indices = @transform_4, window_bounds = array<i64: 1, 2>}, {transform_indices = @transform_5, window_bounds = array<i64: 8, 2>}]} {
    %c0 = arith.constant 0 : index
    %c0_0 = arith.constant 0 : index
    %0 = vector.load %arg1[%c0, %c0_0] : memref<8x32xf32, #tpu.memory_space<vmem>>, vector<8x32xf32>
    %1 = arith.truncf %0 : vector<8x32xf32> to vector<8x32xbf16>
    %c0_1 = arith.constant 0 : index
    %c0_2 = arith.constant 0 : index
    %2 = vector.load %arg2[%c0_1, %c0_2] : memref<32x64xbf16, #tpu.memory_space<vmem>>, vector<32x64xbf16>
    %cst = arith.constant dense<0.000000e+00> : vector<8x64xf32>
    %3 = tpu.matmul %1, %2, %cst {dimension_numbers = #tpu.dot_dimension_numbers<[1], [0], [0], [1], [0, 0, 1, 1], [], []>} : vector<8x32xbf16>, vector<32x64xbf16>, vector<8x64xf32> -> vector<8x64xf32>
    %c0_3 = arith.constant 0 : index
    %c0_4 = arith.constant 0 : index
    %4 = vector.load %arg3[%c0_3, %c0_4] : memref<1x64xf32, #tpu.memory_space<vmem>>, vector<1x64xf32>
    %5 = vector.broadcast %4 : vector<1x64xf32> to vector<8x64xf32>
    %6 = arith.addf %3, %5 : vector<8x64xf32>
    %cst_5 = arith.constant 0.000000e+00 : f32
    %7 = vector.broadcast %cst_5 : f32 to vector<8x64xf32>
    %8 = arith.maximumf %6, %7 : vector<8x64xf32>
    %9 = arith.truncf %8 : vector<8x64xf32> to vector<8x64xbf16>
    %c0_6 = arith.constant 0 : index
    %c0_7 = arith.constant 0 : index
    %10 = vector.load %arg4[%c0_6, %c0_7] : memref<64x2xbf16, #tpu.memory_space<vmem>>, vector<64x2xbf16>
    %cst_8 = arith.constant dense<0.000000e+00> : vector<8x2xf32>
    %11 = tpu.matmul %9, %10, %cst_8 {dimension_numbers = #tpu.dot_dimension_numbers<[1], [0], [0], [1], [0, 0, 1, 1], [], []>} : vector<8x64xbf16>, vector<64x2xbf16>, vector<8x2xf32> -> vector<8x2xf32>
    %c0_9 = arith.constant 0 : index
    %c0_10 = arith.constant 0 : index
    %12 = vector.load %arg5[%c0_9, %c0_10] : memref<1x2xf32, #tpu.memory_space<vmem>>, vector<1x2xf32>
    %13 = vector.broadcast %12 : vector<1x2xf32> to vector<8x2xf32>
    %14 = arith.addf %11, %13 : vector<8x2xf32>
    %c0_11 = arith.constant 0 : index
    %c0_12 = arith.constant 0 : index
    %15 = vector.load %arg6[%c0_11, %c0_12] : memref<8x2xf32, #tpu.memory_space<vmem>>, vector<8x2xf32>
    tpu.vector_store %arg6[%c0_11, %c0_12], %14 {strides = array<i32>} : memref<8x2xf32, #tpu.memory_space<vmem>>, vector<8x2xf32>,
    return
  }
  func.func @transform_0(%arg0: i32) -> (i32, i32) {
    %c0_i32 = arith.constant 0 : i32
    %c0_i32_0 = arith.constant 0 : i32
    return %arg0, %c0_i32 : i32, i32
  }
  func.func @transform_1(%arg0: i32) -> (i32, i32) {
    %c0_i32 = arith.constant 0 : i32
    %c0_i32_0 = arith.constant 0 : i32
    %c0_i32_1 = arith.constant 0 : i32
    return %c0_i32, %c0_i32_0 : i32, i32
  }
  func.func @transform_2(%arg0: i32) -> (i32, i32) {
    %c0_i32 = arith.constant 0 : i32
    %c0_i32_0 = arith.constant 0 : i32
    %c0_i32_1 = arith.constant 0 : i32
    return %c0_i32, %c0_i32_0 : i32, i32
  }
  func.func @transform_3(%arg0: i32) -> (i32, i32) {
    %c0_i32 = arith.constant 0 : i32
    %c0_i32_0 = arith.constant 0 : i32
    %c0_i32_1 = arith.constant 0 : i32
    return %c0_i32, %c0_i32_0 : i32, i32
  }
  func.func @transform_4(%arg0: i32) -> (i32, i32) {
    %c0_i32 = arith.constant 0 : i32
    %c0_i32_0 = arith.constant 0 : i32
    %c0_i32_1 = arith.constant 0 : i32
    return %c0_i32, %c0_i32_0 : i32, i32
  }
  func.func @transform_5(%arg0: i32) -> (i32, i32) {
    %c0_i32 = arith.constant 0 : i32
    %c0_i32_0 = arith.constant 0 : i32
    return %arg0, %c0_i32 : i32, i32
  }
}

</mosaic_0001>

<bundles_post_ra>
// kernel: object_type_classifier.1
= control target key start
LH: loop header
LB: loop body
LE: loop exit
PB: predicated region body
PF: predicated region fallthrough
CT: control target
= control target key end

     0   :  { %vm43_vm0 = vcmask 261120   ;;  %vm98_vm1 = vcmask 523264   ;;  %vm115_vm2 = vcmask 15360   ;;  %s215_s1 = inlined_call_operand.vmem [shape: bf16[32,64], index: 1, kind: input, shape index: {}]   ;;  %s216_s0 = inlined_call_operand.vmem [shape: f32[8,32], index: 0, kind: input, shape index: {}]   ;;  %s217_s3 = inlined_call_operand.vmem [shape: bf16[64,2], index: 3, kind: input, shape index: {}]   ;;  %s218_s2 = inlined_call_operand.vmem [shape: f32[1,64], index: 2, kind: input, shape index: {}]   ;;  %s219_s4 = inlined_call_operand.vmem [shape: f32[1,2], index: 4, kind: input, shape index: {}]   ;;  %s220_s5 = inlined_call_operand.vmem [shape: f32[8,2], index: 5, kind: output, shape index: {}]  }
   0x1   :  { %v148_v0 = vld [vmem:[%s215_s1 + $0x8] sm:$0xff]  ;;  %v152_v1 = vld [vmem:[%s217_s3 + $0x18] sm:$0xff]  ;;  %v147_v2 = vld [vmem:[%s215_s1] sm:$0xff] }
   0x2   :  { %53 = vmatpush.bf16.msra.mxu0 %v148_v0  ;;  %v21_v3 = vld [vmem:[%s216_s0] sm:$0xff]  ;;  %106 = vmatpush.bf16.msra.mxu1 %v152_v1  ;;  %v151_v4 = vld [vmem:[%s217_s3 + $0x10] sm:$0xff]  ;;  %v150_v6 = vld [vmem:[%s217_s3 + $0x8] sm:$0xff] }
   0x3   :  { %v22_v5 = vpack.c.bf16 %v21_v3, %v21_v3  ;;  %v149_v7 = vld [vmem:[%s217_s3] sm:$0xff] }
   0x4   :  { %v153_v8 = vld [vmem:[%s218_s2] ss:$0 sm:$0xff] }
   0x5   :  { %v154_v14 = vld [vmem:[%s219_s4] ss:$0 sm:$0xff] }
   0x6   :  { %54 = vmatpush.bf16.msra.mxu0 %v147_v2  ;;  %107 = vmatpush.bf16.msra.mxu1 %v151_v4 }
   0x9   :  { %129 = vmatmul.msk.bf16.vlgmr.msra.gmra.mxu0 %vm43_vm0, %v22_v5 }
   0xa   :  { %108 = vmatpush.bf16.msra.mxu1 %v150_v6 }
   0xe   :  { %109 = vmatpush.bf16.msra.mxu1 %v149_v7 }
  0x86   :  { %v56_v9 = vpop.f32.mrf.mxu0 }
  0x87   :  { %v57_v10 = vadd.f32 %v153_v8, %v56_v9 }
  0x89   :  { %v60_v11 = vmax.f32 %v57_v10, 0.0 }
  0x8b   :  { %v61_v12 = vpack.c.bf16 %v60_v11, %v60_v11 }
  0x8d   :  { %146 = vmatmul.msk.bf16.vlgmr.msra.gmra.mxu1 %vm98_vm1, %v61_v12 }
  0x8e   :  { %v58_v13 = vpop.f32.mrf.mxu0 }
 0x10a   :  { %v111_v15 = vpop.f32.mrf.mxu1 }
 0x10b   :  { %v112_v16 = vadd.f32 %v154_v14, %v111_v15 }
 0x10d   :  { %116 = vst.msk [vmem:[%s220_s5] sm:$0xff] %vm115_vm2, %v112_v16 }
 0x112   :  { %v113_v17 = vpop.f32.mrf.mxu1 }

</bundles_post_ra>
